<compile_context>
chip_gen: v7x
topology: tpu7x:2x2x1
jax: 0.10.0
libtpu: 0.0.40
codegen_flags: <defaults>
</compile_context>

<pallas_src>
import functools

import jax
import jax.numpy as jnp
from jax import lax
from jax.experimental import pallas as pl
from jax.experimental.pallas import tpu as pltpu


# ---------------------------------------------------------------------------
# Cost-model / hardware constants
# ---------------------------------------------------------------------------
_STEP_OVERHEAD_US = 0.35      # per-grid-step pipeline bubble on TPU
_CHUNK_DMA_LATENCY_US = 1.0   # exposed random-row HBM latency per gather chunk
_RESIDENT_FIXED_US = 0.7      # table-copy issue + gather / one-hot epilogue
_SMALL_ROW_BW_EFF = 0.25      # BW efficiency of tiny row-sized DMAs vs streaming
_ONEHOT_MIN_B = 64            # below this, scalar row copies beat one-hot matmul
_VMEM_FRACTION = 0.7          # headroom for compiler-internal scratch / buffers


def _tpu_hw_params():
    """(vmem_capacity_bytes, hbm_bandwidth_GBps) with conservative fallbacks."""
    vmem_cap = 64 << 20          # v7x per-TensorCore VMEM (smallest in the fleet)
    hbm_gbps = 800.0             # ~v5e HBM BW (slowest in the fleet)
    try:
        vmem_cap = int(pltpu.get_tpu_info().vmem_capacity_bytes)
    except Exception:
        pass
    try:
        kind = jax.devices()[0].device_kind.lower()
        if "v5" in kind:
            hbm_gbps = 820.0
        elif "v6" in kind or "trillium" in kind:
            hbm_gbps = 1360.0
        elif "v7" in kind:
            hbm_gbps = 3200.0
    except Exception:
        pass
    return vmem_cap, hbm_gbps


def _vmem_tile_bytes(rows, cols, itemsize):
    """VMEM footprint of a (rows, cols) buffer after (8, 128) tile padding."""
    return (-(-rows // 8) * 8) * (-(-cols // 128) * 128) * itemsize


# ---------------------------------------------------------------------------
# Kernels
# ---------------------------------------------------------------------------
def _resident_table_kernel(ids_smem, ids_vmem, table_hbm, out_ref,
                           table_vmem, copy_sem, *, use_onehot):
    # Stream the whole embedding table HBM -> VMEM exactly once.  The table is
    # a scratch buffer (single-buffered), not a pipelined BlockSpec input, so
    # there is no 2x double-buffer footprint.
    cp = pltpu.make_async_copy(table_hbm, table_vmem, copy_sem.at[0])
    cp.start()
    cp.wait()

    if use_onehot:
        # Vectorized gather on the MXU: one_hot(ids) @ table -> (B, D) in one
        # dense op (lane/sublane-dense result, no serial per-row loads/stores).
        ids = ids_vmem[...]                                     # (B, 1) int32
        bsz = ids.shape[0]
        n_classes = table_vmem.shape[0]
        iota = lax.broadcasted_iota(jnp.int32, (bsz, n_classes), 1)
        onehot = (iota == ids).astype(table_vmem.dtype)         # exact 0/1 weights
        res = jnp.dot(onehot, table_vmem[...],
                      preferred_element_type=jnp.float32)
        out_ref[...] = res.astype(out_ref.dtype)
    else:
        # Tiny B: a handful of scalar-indexed row copies (bounded unroll,
        # gated to B < _ONEHOT_MIN_B in the wrapper).
        for b in range(out_ref.shape[0]):
            idx = ids_smem[b]                                   # scalar from SMEM
            out_ref[pl.ds(b, 1), :] = table_vmem[pl.ds(idx, 1), :]


def _chunked_gather_kernel(ids_smem, table_hbm, out_ref, buf, sems):
    # Large-table fallback: table stays in HBM; each grid step gathers one
    # chunk of rows with per-row DMAs issued all at once (latencies overlap),
    # double-buffered across steps (prefetch chunk i+1 while draining chunk i).
    step = pl.program_id(0)
    nsteps = pl.num_programs(0)
    chunk = out_ref.shape[0]

    def issue(chunk_start, slot):
        for r in range(chunk):
            rid = ids_smem[chunk_start + r]
            pltpu.make_async_copy(
                table_hbm.at[pl.ds(rid, 1), :],
                buf.at[slot, pl.ds(r, 1), :],
                sems.at[slot, r],
            ).start()

    # Prime the pipeline: fetch chunk 0 into slot 0 on the first step.
    @pl.when(step == 0)
    def _():
        issue(0, 0)

    slot = step & 1

    # Prefetch the next chunk into the other slot while this one drains.
    @pl.when(step + 1 < nsteps)
    def _():
        issue((step + 1) * chunk, 1 - slot)

    # Wait for every row of the current chunk, then store one dense slab.
    for r in range(chunk):
        pltpu.make_async_copy(
            table_hbm.at[pl.ds(0, 1), :],          # shape-only for the wait
            buf.at[slot, pl.ds(r, 1), :],
            sems.at[slot, r],
        ).wait()
    out_ref[...] = buf[slot]


# ---------------------------------------------------------------------------
# pallas_call wrappers
# ---------------------------------------------------------------------------
def _resident_forward(ids, table, use_onehot, vmem_need, vmem_cap):
    n_classes, embed_dim = table.shape
    B = ids.shape[0]
    ids_2d = ids.reshape(B, 1)
    vmem_limit = min(vmem_cap - (4 << 20), max(vmem_need, 32 << 20))

    kernel = functools.partial(_resident_table_kernel, use_onehot=use_onehot)
    return pl.pallas_call(
        kernel,
        out_shape=jax.ShapeDtypeStruct((B, embed_dim), table.dtype),
        grid_spec=pltpu.PrefetchScalarGridSpec(
            num_scalar_prefetch=1,                  # ids -> SMEM
            grid=(1,),                              # one step: no per-row bubbles
            in_specs=[
                pl.BlockSpec((B, 1), lambda i, ids_ref: (0, 0)),  # ids in VMEM
                pl.BlockSpec(memory_space=pl.ANY),                # table in HBM
            ],
            out_specs=pl.BlockSpec((B, embed_dim), lambda i, ids_ref: (0, 0)),
            scratch_shapes=[
                pltpu.VMEM((n_classes, embed_dim), table.dtype),  # 1x table copy
                pltpu.SemaphoreType.DMA((1,)),
            ],
        ),
        compiler_params=pltpu.CompilerParams(
            dimension_semantics=("arbitrary",),
            # The table lives exactly once in VMEM scratch; raise the scoped
            # limit just enough for it (per-generation capacity aware).
            vmem_limit_bytes=int(vmem_limit),
        ),
        # TODO(synk): on v7x (2 TensorCores) a large-B resident path could split
        # the batch over a grid=(2,) "parallel" axis (each core re-streams the
        # small table); kept grid=(1,) here since the one-hot MXU gather already
        # handles large B in a single dense op.
    )(ids, ids_2d, table)


def _gather_forward(ids, table, chunk):
    n_classes, embed_dim = table.shape
    B = ids.shape[0]
    num_chunks = pl.cdiv(B, chunk)
    b_pad = num_chunks * chunk
    if b_pad != B:
        ids = jnp.pad(ids, (0, b_pad - B))   # pad with id 0 (valid row, discarded)

    return pl.pallas_call(
        _chunked_gather_kernel,
        out_shape=jax.ShapeDtypeStruct((b_pad, embed_dim), table.dtype),
        grid_spec=pltpu.PrefetchScalarGridSpec(
            num_scalar_prefetch=1,                        # ids -> SMEM
            grid=(num_chunks,),
            in_specs=[pl.BlockSpec(memory_space=pl.ANY)],  # table stays in HBM
            out_specs=pl.BlockSpec((chunk, embed_dim), lambda i, ids_ref: (i, 0)),
            scratch_shapes=[
                pltpu.VMEM((2, chunk, embed_dim), table.dtype),  # chunk dbl-buffer
                pltpu.SemaphoreType.DMA((2, chunk)),
            ],
        ),
        compiler_params=pltpu.CompilerParams(
            # Cross-step double-buffer state (slot / semaphore carry) means the
            # chunk axis must stay "arbitrary"; a "parallel" megacore split
            # across v7x cores would break the carried prefetch.
            dimension_semantics=("arbitrary",),
        ),
    )(ids, table)


def class_embedder_forward(batch, embedding_table, key="class", force_path=None):
    """Pallas equivalent of ClassEmbedder.forward: (B,) int ids -> (B, 1, D)."""
    ids = jnp.asarray(batch[key]).astype(jnp.int32).reshape(-1)       # (B,)
    n_classes, embed_dim = embedding_table.shape
    itemsize = embedding_table.dtype.itemsize
    B = ids.shape[0]

    # TODO(synk): nn.Embedding raises on out-of-range ids; we clamp instead so a
    # bad id can never trigger an out-of-bounds DMA (silent remap, not an error).
    ids = jnp.clip(ids, 0, n_classes - 1)

    vmem_cap, hbm_gbps = _tpu_hw_params()
    us_per_byte = 1.0 / (hbm_gbps * 1e3)                 # GB/s -> us per byte

    table_bytes = n_classes * embed_dim * itemsize
    row_bytes = embed_dim * itemsize
    chunk = 16 if B > 16 else 8                          # gather rows per grid step
    num_chunks = pl.cdiv(B, chunk)

    use_onehot = (B >= _ONEHOT_MIN_B) and bool(
        jnp.issubdtype(embedding_table.dtype, jnp.floating))

    # VMEM footprint of the resident-table path ((8,128)-tile padded) + headroom.
    resident_need = (
        _vmem_tile_bytes(n_classes, embed_dim, itemsize)             # table scratch
        + _vmem_tile_bytes(B, embed_dim, itemsize)                   # output block
        + (_vmem_tile_bytes(B, n_classes, 4) if use_onehot else 0)   # one-hot temp
        + (4 << 20))                                                 # headroom
    fits_vmem = resident_need <= int(_VMEM_FRACTION * vmem_cap)

    # Cost model (us): stream the table once vs. chunked random-row DMA gather.
    resident_us = table_bytes * us_per_byte + _RESIDENT_FIXED_US
    gather_us = (num_chunks * _STEP_OVERHEAD_US + _CHUNK_DMA_LATENCY_US
                 + B * row_bytes * us_per_byte / _SMALL_ROW_BW_EFF)

    if force_path == "resident":
        use_resident = True
    elif force_path == "gather":
        use_resident = False
    else:
        use_resident = fits_vmem and (resident_us <= gather_us)

    if use_resident:
        out2d = _resident_forward(ids, embedding_table, use_onehot,
                                  resident_need, vmem_cap)
    else:
        out2d = _gather_forward(ids, embedding_table, chunk)[:B]

    # Kernels emit a lane/sublane-dense (B, D) slab; the module's unit dim is a
    # free metadata reshape here (no masked sublane-1 stores inside the kernel).
    return out2d[:, None, :]


if __name__ == "__main__":
    n_classes = 1000
    embed_dim = 32
    B = 2

    root = jax.random.PRNGKey(0)
    k_emb, k_ids = jax.random.split(root)

    # Deterministic synthetic parameters (nn.Embedding(n_classes, embed_dim).weight)
    embedding_table = jax.random.normal(k_emb, (n_classes, embed_dim),
                                        dtype=jnp.float32)
    class_ids = jax.random.randint(k_ids, (B,), 0, n_classes, dtype=jnp.int32)
    batch = {"class": class_ids}

    # Primary run (cost model picks the resident-table path at this size).
    out = jax.block_until_ready(class_embedder_forward(batch, embedding_table))
    ref = jnp.take(embedding_table, class_ids, axis=0)[:, None, :]
    assert out.shape == (B, 1, embed_dim), out.shape
    assert out.dtype == jnp.float32
    assert jnp.allclose(out, ref), "mismatch vs reference gather (resident path)"

    # Also exercise the chunked manual-DMA gather fallback (forced) with a
    # non-multiple-of-chunk batch so padding + double-buffering are covered.
    ids2 = jax.random.randint(jax.random.PRNGKey(1), (10,), 0, n_classes,
                              dtype=jnp.int32)
    out2 = jax.block_until_ready(
        class_embedder_forward({"class": ids2}, embedding_table,
                               force_path="gather"))
    ref2 = jnp.take(embedding_table, ids2, axis=0)[:, None, :]
    assert jnp.allclose(out2, ref2), "mismatch vs reference gather (gather path)"

    # And the MXU one-hot variant of the resident path (large-B branch).
    ids3 = jax.random.randint(jax.random.PRNGKey(2), (64,), 0, n_classes,
                              dtype=jnp.int32)
    out3 = jax.block_until_ready(
        class_embedder_forward({"class": ids3}, embedding_table,
                               force_path="resident"))
    ref3 = jnp.take(embedding_table, ids3, axis=0)[:, None, :]
    assert jnp.allclose(out3, ref3), "mismatch vs reference gather (one-hot path)"

    print("KERNEL_OK")
</pallas_src>

<mosaic_0001>
module attributes {stable_mosaic.version = 11 : i64} {
  func.func @_resident_table_kernel(%arg0: i32, %arg1: memref<2xi32, #tpu.memory_space<smem>>, %arg2: memref<2x1xi32, #tpu.memory_space<vmem>>, %arg3: memref<1000x32xf32, #tpu.memory_space<any>>, %arg4: memref<2x32xf32, #tpu.memory_space<vmem>>, %arg5: memref<1000x32xf32, #tpu.memory_space<vmem>>, %arg6: memref<1x!tpu.dma_semaphore, #tpu.memory_space<semaphore_mem>>) attributes {dimension_semantics = [#tpu.dimension_semantics<arbitrary>], iteration_bounds = array<i64: 1>, scalar_prefetch = 1 : i64, scratch_operands = 2 : i64, tpu.core_type = #tpu.core_type<tc>, window_params = [{pipeline_mode = #tpu.pipeline_mode<synchronous>, transform_indices = @transform_0, window_bounds = array<i64: 2, 1>}, {}, {pipeline_mode = #tpu.pipeline_mode<synchronous>, transform_indices = @transform_2, window_bounds = array<i64: 2, 32>}]} {
    %c0_i32 = arith.constant 0 : i32
    %0 = tpu.memref_slice %arg6[%c0_i32] : memref<1x!tpu.dma_semaphore, #tpu.memory_space<semaphore_mem>> -> memref<1x!tpu.dma_semaphore, #tpu.memory_space<semaphore_mem>>
    %1 = tpu.memref_squeeze %0 : memref<1x!tpu.dma_semaphore, #tpu.memory_space<semaphore_mem>> -> memref<!tpu.dma_semaphore, #tpu.memory_space<semaphore_mem>>
    tpu.enqueue_dma source(%arg3 : memref<1000x32xf32, #tpu.memory_space<any>>) target(%arg5 : memref<1000x32xf32, #tpu.memory_space<vmem>>) target_semaphore(%1 : memref<!tpu.dma_semaphore, #tpu.memory_space<semaphore_mem>>)
    %c0_i32_0 = arith.constant 0 : i32
    %2 = tpu.memref_slice %arg6[%c0_i32_0] : memref<1x!tpu.dma_semaphore, #tpu.memory_space<semaphore_mem>> -> memref<1x!tpu.dma_semaphore, #tpu.memory_space<semaphore_mem>>
    %3 = tpu.memref_squeeze %2 : memref<1x!tpu.dma_semaphore, #tpu.memory_space<semaphore_mem>> -> memref<!tpu.dma_semaphore, #tpu.memory_space<semaphore_mem>>
    tpu.wait_dma2 semaphore(%3 : memref<!tpu.dma_semaphore, #tpu.memory_space<semaphore_mem>>) src(%arg3 : memref<1000x32xf32, #tpu.memory_space<any>>) dst(%arg5 : memref<1000x32xf32, #tpu.memory_space<vmem>>)
    %c0 = arith.constant 0 : index
    %4 = memref.load %arg1[%c0] : memref<2xi32, #tpu.memory_space<smem>>
    %5 = arith.index_cast %4 : i32 to index
    %c0_1 = arith.constant 0 : index
    %6 = vector.load %arg5[%5, %c0_1] : memref<1000x32xf32, #tpu.memory_space<vmem>>, vector<1x32xf32>
    %c0_2 = arith.constant 0 : index
    %c0_3 = arith.constant 0 : index
    %7 = vector.load %arg4[%c0_2, %c0_3] : memref<2x32xf32, #tpu.memory_space<vmem>>, vector<1x32xf32>
    tpu.vector_store %arg4[%c0_2, %c0_3], %6 {strides = array<i32>} : memref<2x32xf32, #tpu.memory_space<vmem>>, vector<1x32xf32>,
    %c1 = arith.constant 1 : index
    %8 = memref.load %arg1[%c1] : memref<2xi32, #tpu.memory_space<smem>>
    %9 = arith.index_cast %8 : i32 to index
    %c0_4 = arith.constant 0 : index
    %10 = vector.load %arg5[%9, %c0_4] : memref<1000x32xf32, #tpu.memory_space<vmem>>, vector<1x32xf32>
    %c1_5 = arith.constant 1 : index
    %c0_6 = arith.constant 0 : index
    %11 = vector.load %arg4[%c1_5, %c0_6] : memref<2x32xf32, #tpu.memory_space<vmem>>, vector<1x32xf32>
    tpu.vector_store %arg4[%c1_5, %c0_6], %10 {strides = array<i32>} : memref<2x32xf32, #tpu.memory_space<vmem>>, vector<1x32xf32>,
    return
  }
  func.func @transform_0(%arg0: i32, %arg1: memref<2xi32, #tpu.memory_space<smem>>) -> (i32, i32) {
    %c0_i32 = arith.constant 0 : i32
    %c0_i32_0 = arith.constant 0 : i32
    %c0_i32_1 = arith.constant 0 : i32
    return %c0_i32, %c0_i32_0 : i32, i32
  }
  func.func @transform_2(%arg0: i32, %arg1: memref<2xi32, #tpu.memory_space<smem>>) -> (i32, i32) {
    %c0_i32 = arith.constant 0 : i32
    %c0_i32_0 = arith.constant 0 : i32
    %c0_i32_1 = arith.constant 0 : i32
    return %c0_i32, %c0_i32_0 : i32, i32
  }
}

</mosaic_0001>

<bundles_post_ra>
// kernel: tpu_custom_call.1
= control target key start
LH: loop header
LB: loop body
LE: loop exit
PB: predicated region body
PF: predicated region fallthrough
CT: control target
= control target key end

     0   :  { %s805_s0 = inlined_call_operand.vmem [shape: s32[2], index: 0, kind: input, shape index: {}]   ;;  %s806_s1 = inlined_call_operand.vmem [shape: s32[2,1], index: 1, kind: input, shape index: {}]   ;;  %s807_s2 = inlined_call_operand.vmem [shape: f32[1000,32], index: 2, kind: input, shape index: {}]   ;;  %s808_s3 = inlined_call_operand.hbm [shape: f32[2,32], index: 3, kind: output, shape index: {}]  }
   0x1   :  { %s8_s14 = sshll.u32 %s805_s0, 4  ;;  %s9_s14 = int_to_ptr.vmem [resolvable:$true] %s8_s14 }
   0x2   :  { %s353_s15 = scalar_lea.vmem %s9_s14, 16  ;;  %p358_p1 = scmp.lt.s32.totalorder %s9_s14, %s9_s14 }
   0x3   :  { %p354_p0 = scmp.ne.s32.totalorder %s9_s14, %s353_s15  ;;  %p359_p2 = scmp.lt.s32.totalorder %s353_s15, %s353_s15 }
   0x5   :  { %p360_p3 = por %p359_p2, %p358_p1 }
   0x7   :  { %p361_p4 = pnand %p360_p3, %p354_p0 }
   0x9   :  { %364 = shalt.err (!%p361_p4)  }
   0xa   :  { %s393_s16 = smov [#allocation5]  }
   0xb   :  { %11 = dma.vmem_to_smem %s9_s14, 16, %s393_s16, [#allocation4] }
   0xc   :  { %387 = dma.done.wait [#allocation4], 16 }
   0xd   :  { %388 = vsyncadd [#allocation4], 4294967280 }
   0xe   :  { %13 = sfence }
   0xf   :  { %14 = vsyncpa [#allocation7], 0  ;;  %v49_v0 = vld [vmem:[%s807_s2] sm:$0xff]  ;;  %v51_v1 = vld [vmem:[%s807_s2 + $0x8] sm:$0xff] }
  0x10   :  { %50 = vst [vmem:[#allocation2] sm:$0xff] %v49_v0  ;;  %52 = vst [vmem:[#allocation2 + $0x8] sm:$0xff] %v51_v1  ;;  %v53_v2 = vld [vmem:[%s807_s2 + $0x10] sm:$0xff]  ;;  %v55_v3 = vld [vmem:[%s807_s2 + $0x18] sm:$0xff] }
  0x11   :  { %v57_v4 = vld [vmem:[%s807_s2 + $0x20] sm:$0xff]  ;;  %54 = vst [vmem:[#allocation2 + $0x10] sm:$0xff] %v53_v2  ;;  %56 = vst [vmem:[#allocation2 + $0x18] sm:$0xff] %v55_v3  ;;  %v59_v5 = vld [vmem:[%s807_s2 + $0x28] sm:$0xff] }
  0x12   :  { %58 = vst [vmem:[#allocation2 + $0x20] sm:$0xff] %v57_v4  ;;  %v61_v6 = vld [vmem:[%s807_s2 + $0x30] sm:$0xff]  ;;  %v63_v7 = vld [vmem:[%s807_s2 + $0x38] sm:$0xff]  ;;  %60 = vst [vmem:[#allocation2 + $0x28] sm:$0xff] %v59_v5 }
  0x13   :  { %62 = vst [vmem:[#allocation2 + $0x30] sm:$0xff] %v61_v6  ;;  %64 = vst [vmem:[#allocation2 + $0x38] sm:$0xff] %v63_v7  ;;  %v65_v8 = vld [vmem:[%s807_s2 + $0x40] sm:$0xff]  ;;  %v67_v9 = vld [vmem:[%s807_s2 + $0x48] sm:$0xff] }
  0x14   :  { %v69_v10 = vld [vmem:[%s807_s2 + $0x50] sm:$0xff]  ;;  %66 = vst [vmem:[#allocation2 + $0x40] sm:$0xff] %v65_v8  ;;  %68 = vst [vmem:[#allocation2 + $0x48] sm:$0xff] %v67_v9  ;;  %v71_v11 = vld [vmem:[%s807_s2 + $0x58] sm:$0xff] }
  0x15   :  { %70 = vst [vmem:[#allocation2 + $0x50] sm:$0xff] %v69_v10  ;;  %v73_v12 = vld [vmem:[%s807_s2 + $0x60] sm:$0xff]  ;;  %v75_v13 = vld [vmem:[%s807_s2 + $0x68] sm:$0xff]  ;;  %72 = vst [vmem:[#allocation2 + $0x58] sm:$0xff] %v71_v11 }
  0x16   :  { %74 = vst [vmem:[#allocation2 + $0x60] sm:$0xff] %v73_v12  ;;  %76 = vst [vmem:[#allocation2 + $0x68] sm:$0xff] %v75_v13  ;;  %v77_v14 = vld [vmem:[%s807_s2 + $0x70] sm:$0xff]  ;;  %v79_v15 = vld [vmem:[%s807_s2 + $0x78] sm:$0xff] }
  0x17   :  { %v81_v16 = vld [vmem:[%s807_s2 + $0x80] sm:$0xff]  ;;  %78 = vst [vmem:[#allocation2 + $0x70] sm:$0xff] %v77_v14  ;;  %80 = vst [vmem:[#allocation2 + $0x78] sm:$0xff] %v79_v15  ;;  %v83_v17 = vld [vmem:[%s807_s2 + $0x88] sm:$0xff] }
  0x18   :  { %82 = vst [vmem:[#allocation2 + $0x80] sm:$0xff] %v81_v16  ;;  %v85_v18 = vld [vmem:[%s807_s2 + $0x90] sm:$0xff]  ;;  %v87_v19 = vld [vmem:[%s807_s2 + $0x98] sm:$0xff]  ;;  %84 = vst [vmem:[#allocation2 + $0x88] sm:$0xff] %v83_v17 }
  0x19   :  { %86 = vst [vmem:[#allocation2 + $0x90] sm:$0xff] %v85_v18  ;;  %88 = vst [vmem:[#allocation2 + $0x98] sm:$0xff] %v87_v19  ;;  %v89_v20 = vld [vmem:[%s807_s2 + $0xa0] sm:$0xff]  ;;  %v91_v21 = vld [vmem:[%s807_s2 + $0xa8] sm:$0xff] }
  0x1a   :  { %v93_v22 = vld [vmem:[%s807_s2 + $0xb0] sm:$0xff]  ;;  %90 = vst [vmem:[#allocation2 + $0xa0] sm:$0xff] %v89_v20  ;;  %92 = vst [vmem:[#allocation2 + $0xa8] sm:$0xff] %v91_v21  ;;  %v95_v23 = vld [vmem:[%s807_s2 + $0xb8] sm:$0xff] }
  0x1b   :  { %94 = vst [vmem:[#allocation2 + $0xb0] sm:$0xff] %v93_v22  ;;  %v97_v24 = vld [vmem:[%s807_s2 + $0xc0] sm:$0xff]  ;;  %v99_v25 = vld [vmem:[%s807_s2 + $0xc8] sm:$0xff]  ;;  %96 = vst [vmem:[#allocation2 + $0xb8] sm:$0xff] %v95_v23 }
  0x1c   :  { %98 = vst [vmem:[#allocation2 + $0xc0] sm:$0xff] %v97_v24  ;;  %100 = vst [vmem:[#allocation2 + $0xc8] sm:$0xff] %v99_v25  ;;  %v101_v26 = vld [vmem:[%s807_s2 + $0xd0] sm:$0xff]  ;;  %v103_v27 = vld [vmem:[%s807_s2 + $0xd8] sm:$0xff] }
  0x1d   :  { %v105_v28 = vld [vmem:[%s807_s2 + $0xe0] sm:$0xff]  ;;  %102 = vst [vmem:[#allocation2 + $0xd0] sm:$0xff] %v101_v26  ;;  %104 = vst [vmem:[#allocation2 + $0xd8] sm:$0xff] %v103_v27  ;;  %v107_v29 = vld [vmem:[%s807_s2 + $0xe8] sm:$0xff] }
  0x1e   :  { %106 = vst [vmem:[#allocation2 + $0xe0] sm:$0xff] %v105_v28  ;;  %v109_v30 = vld [vmem:[%s807_s2 + $0xf0] sm:$0xff]  ;;  %v111_v31 = vld [vmem:[%s807_s2 + $0xf8] sm:$0xff]  ;;  %108 = vst [vmem:[#allocation2 + $0xe8] sm:$0xff] %v107_v29 }
  0x1f   :  { %110 = vst [vmem:[#allocation2 + $0xf0] sm:$0xff] %v109_v30  ;;  %112 = vst [vmem:[#allocation2 + $0xf8] sm:$0xff] %v111_v31  ;;  %v113_v32 = vld [vmem:[%s807_s2 + $0x100] sm:$0xff]  ;;  %v115_v33 = vld [vmem:[%s807_s2 + $0x108] sm:$0xff] }
  0x20   :  { %v117_v34 = vld [vmem:[%s807_s2 + $0x110] sm:$0xff]  ;;  %114 = vst [vmem:[#allocation2 + $0x100] sm:$0xff] %v113_v32  ;;  %116 = vst [vmem:[#allocation2 + $0x108] sm:$0xff] %v115_v33  ;;  %v119_v35 = vld [vmem:[%s807_s2 + $0x118] sm:$0xff] }
  0x21   :  { %118 = vst [vmem:[#allocation2 + $0x110] sm:$0xff] %v117_v34  ;;  %v121_v36 = vld [vmem:[%s807_s2 + $0x120] sm:$0xff]  ;;  %v123_v37 = vld [vmem:[%s807_s2 + $0x128] sm:$0xff]  ;;  %120 = vst [vmem:[#allocation2 + $0x118] sm:$0xff] %v119_v35 }
  0x22   :  { %122 = vst [vmem:[#allocation2 + $0x120] sm:$0xff] %v121_v36  ;;  %124 = vst [vmem:[#allocation2 + $0x128] sm:$0xff] %v123_v37  ;;  %v125_v38 = vld [vmem:[%s807_s2 + $0x130] sm:$0xff]  ;;  %v127_v39 = vld [vmem:[%s807_s2 + $0x138] sm:$0xff] }
  0x23   :  { %v129_v40 = vld [vmem:[%s807_s2 + $0x140] sm:$0xff]  ;;  %126 = vst [vmem:[#allocation2 + $0x130] sm:$0xff] %v125_v38  ;;  %128 = vst [vmem:[#allocation2 + $0x138] sm:$0xff] %v127_v39  ;;  %v131_v41 = vld [vmem:[%s807_s2 + $0x148] sm:$0xff] }
  0x24   :  { %130 = vst [vmem:[#allocation2 + $0x140] sm:$0xff] %v129_v40  ;;  %v133_v42 = vld [vmem:[%s807_s2 + $0x150] sm:$0xff]  ;;  %v135_v43 = vld [vmem:[%s807_s2 + $0x158] sm:$0xff]  ;;  %132 = vst [vmem:[#allocation2 + $0x148] sm:$0xff] %v131_v41 }
  0x25   :  { %134 = vst [vmem:[#allocation2 + $0x150] sm:$0xff] %v133_v42  ;;  %136 = vst [vmem:[#allocation2 + $0x158] sm:$0xff] %v135_v43  ;;  %v137_v44 = vld [vmem:[%s807_s2 + $0x160] sm:$0xff]  ;;  %v139_v45 = vld [vmem:[%s807_s2 + $0x168] sm:$0xff] }
  0x26   :  { %v141_v46 = vld [vmem:[%s807_s2 + $0x170] sm:$0xff]  ;;  %138 = vst [vmem:[#allocation2 + $0x160] sm:$0xff] %v137_v44  ;;  %140 = vst [vmem:[#allocation2 + $0x168] sm:$0xff] %v139_v45  ;;  %v143_v47 = vld [vmem:[%s807_s2 + $0x178] sm:$0xff] }
  0x27   :  { %142 = vst [vmem:[#allocation2 + $0x170] sm:$0xff] %v141_v46  ;;  %v145_v48 = vld [vmem:[%s807_s2 + $0x180] sm:$0xff]  ;;  %v147_v49 = vld [vmem:[%s807_s2 + $0x188] sm:$0xff]  ;;  %144 = vst [vmem:[#allocation2 + $0x178] sm:$0xff] %v143_v47 }
  0x28   :  { %146 = vst [vmem:[#allocation2 + $0x180] sm:$0xff] %v145_v48  ;;  %148 = vst [vmem:[#allocation2 + $0x188] sm:$0xff] %v147_v49  ;;  %v149_v50 = vld [vmem:[%s807_s2 + $0x190] sm:$0xff]  ;;  %v151_v51 = vld [vmem:[%s807_s2 + $0x198] sm:$0xff] }
  0x29   :  { %v153_v52 = vld [vmem:[%s807_s2 + $0x1a0] sm:$0xff]  ;;  %150 = vst [vmem:[#allocation2 + $0x190] sm:$0xff] %v149_v50  ;;  %152 = vst [vmem:[#allocation2 + $0x198] sm:$0xff] %v151_v51  ;;  %v155_v53 = vld [vmem:[%s807_s2 + $0x1a8] sm:$0xff] }
  0x2a   :  { %154 = vst [vmem:[#allocation2 + $0x1a0] sm:$0xff] %v153_v52  ;;  %v157_v54 = vld [vmem:[%s807_s2 + $0x1b0] sm:$0xff]  ;;  %v159_v55 = vld [vmem:[%s807_s2 + $0x1b8] sm:$0xff]  ;;  %156 = vst [vmem:[#allocation2 + $0x1a8] sm:$0xff] %v155_v53 }
  0x2b   :  { %158 = vst [vmem:[#allocation2 + $0x1b0] sm:$0xff] %v157_v54  ;;  %160 = vst [vmem:[#allocation2 + $0x1b8] sm:$0xff] %v159_v55  ;;  %v161_v56 = vld [vmem:[%s807_s2 + $0x1c0] sm:$0xff]  ;;  %v163_v57 = vld [vmem:[%s807_s2 + $0x1c8] sm:$0xff] }
  0x2c   :  { %v165_v58 = vld [vmem:[%s807_s2 + $0x1d0] sm:$0xff]  ;;  %162 = vst [vmem:[#allocation2 + $0x1c0] sm:$0xff] %v161_v56  ;;  %164 = vst [vmem:[#allocation2 + $0x1c8] sm:$0xff] %v163_v57  ;;  %v167_v59 = vld [vmem:[%s807_s2 + $0x1d8] sm:$0xff] }
  0x2d   :  { %166 = vst [vmem:[#allocation2 + $0x1d0] sm:$0xff] %v165_v58  ;;  %v169_v60 = vld [vmem:[%s807_s2 + $0x1e0] sm:$0xff]  ;;  %v171_v61 = vld [vmem:[%s807_s2 + $0x1e8] sm:$0xff]  ;;  %168 = vst [vmem:[#allocation2 + $0x1d8] sm:$0xff] %v167_v59 }
  0x2e   :  { %170 = vst [vmem:[#allocation2 + $0x1e0] sm:$0xff] %v169_v60  ;;  %172 = vst [vmem:[#allocation2 + $0x1e8] sm:$0xff] %v171_v61  ;;  %v173_v62 = vld [vmem:[%s807_s2 + $0x1f0] sm:$0xff]  ;;  %v175_v63 = vld [vmem:[%s807_s2 + $0x1f8] sm:$0xff] }
  0x2f   :  { %v177_v0 = vld [vmem:[%s807_s2 + $0x200] sm:$0xff]  ;;  %174 = vst [vmem:[#allocation2 + $0x1f0] sm:$0xff] %v173_v62  ;;  %176 = vst [vmem:[#allocation2 + $0x1f8] sm:$0xff] %v175_v63  ;;  %v179_v1 = vld [vmem:[%s807_s2 + $0x208] sm:$0xff] }
  0x30   :  { %178 = vst [vmem:[#allocation2 + $0x200] sm:$0xff] %v177_v0  ;;  %v181_v2 = vld [vmem:[%s807_s2 + $0x210] sm:$0xff]  ;;  %v183_v3 = vld [vmem:[%s807_s2 + $0x218] sm:$0xff]  ;;  %180 = vst [vmem:[#allocation2 + $0x208] sm:$0xff] %v179_v1 }
  0x31   :  { %182 = vst [vmem:[#allocation2 + $0x210] sm:$0xff] %v181_v2  ;;  %184 = vst [vmem:[#allocation2 + $0x218] sm:$0xff] %v183_v3  ;;  %v185_v4 = vld [vmem:[%s807_s2 + $0x220] sm:$0xff]  ;;  %v187_v5 = vld [vmem:[%s807_s2 + $0x228] sm:$0xff] }
  0x32   :  { %v189_v6 = vld [vmem:[%s807_s2 + $0x230] sm:$0xff]  ;;  %186 = vst [vmem:[#allocation2 + $0x220] sm:$0xff] %v185_v4  ;;  %188 = vst [vmem:[#allocation2 + $0x228] sm:$0xff] %v187_v5  ;;  %v191_v7 = vld [vmem:[%s807_s2 + $0x238] sm:$0xff] }
  0x33   :  { %190 = vst [vmem:[#allocation2 + $0x230] sm:$0xff] %v189_v6  ;;  %v193_v8 = vld [vmem:[%s807_s2 + $0x240] sm:$0xff]  ;;  %v195_v9 = vld [vmem:[%s807_s2 + $0x248] sm:$0xff]  ;;  %192 = vst [vmem:[#allocation2 + $0x238] sm:$0xff] %v191_v7 }
  0x34   :  { %194 = vst [vmem:[#allocation2 + $0x240] sm:$0xff] %v193_v8  ;;  %196 = vst [vmem:[#allocation2 + $0x248] sm:$0xff] %v195_v9  ;;  %v197_v10 = vld [vmem:[%s807_s2 + $0x250] sm:$0xff]  ;;  %v199_v11 = vld [vmem:[%s807_s2 + $0x258] sm:$0xff] }
  0x35   :  { %v201_v12 = vld [vmem:[%s807_s2 + $0x260] sm:$0xff]  ;;  %198 = vst [vmem:[#allocation2 + $0x250] sm:$0xff] %v197_v10  ;;  %200 = vst [vmem:[#allocation2 + $0x258] sm:$0xff] %v199_v11  ;;  %v203_v13 = vld [vmem:[%s807_s2 + $0x268] sm:$0xff] }
  0x36   :  { %202 = vst [vmem:[#allocation2 + $0x260] sm:$0xff] %v201_v12  ;;  %v205_v14 = vld [vmem:[%s807_s2 + $0x270] sm:$0xff]  ;;  %v207_v15 = vld [vmem:[%s807_s2 + $0x278] sm:$0xff]  ;;  %204 = vst [vmem:[#allocation2 + $0x268] sm:$0xff] %v203_v13 }
  0x37   :  { %206 = vst [vmem:[#allocation2 + $0x270] sm:$0xff] %v205_v14  ;;  %208 = vst [vmem:[#allocation2 + $0x278] sm:$0xff] %v207_v15  ;;  %v209_v16 = vld [vmem:[%s807_s2 + $0x280] sm:$0xff]  ;;  %v211_v17 = vld [vmem:[%s807_s2 + $0x288] sm:$0xff] }
  0x38   :  { %v213_v18 = vld [vmem:[%s807_s2 + $0x290] sm:$0xff]  ;;  %210 = vst [vmem:[#allocation2 + $0x280] sm:$0xff] %v209_v16  ;;  %212 = vst [vmem:[#allocation2 + $0x288] sm:$0xff] %v211_v17  ;;  %v215_v19 = vld [vmem:[%s807_s2 + $0x298] sm:$0xff] }
  0x39   :  { %214 = vst [vmem:[#allocation2 + $0x290] sm:$0xff] %v213_v18  ;;  %v217_v20 = vld [vmem:[%s807_s2 + $0x2a0] sm:$0xff]  ;;  %v219_v21 = vld [vmem:[%s807_s2 + $0x2a8] sm:$0xff]  ;;  %216 = vst [vmem:[#allocation2 + $0x298] sm:$0xff] %v215_v19 }
  0x3a   :  { %218 = vst [vmem:[#allocation2 + $0x2a0] sm:$0xff] %v217_v20  ;;  %220 = vst [vmem:[#allocation2 + $0x2a8] sm:$0xff] %v219_v21  ;;  %v221_v22 = vld [vmem:[%s807_s2 + $0x2b0] sm:$0xff]  ;;  %v223_v23 = vld [vmem:[%s807_s2 + $0x2b8] sm:$0xff] }
  0x3b   :  { %v225_v24 = vld [vmem:[%s807_s2 + $0x2c0] sm:$0xff]  ;;  %222 = vst [vmem:[#allocation2 + $0x2b0] sm:$0xff] %v221_v22  ;;  %224 = vst [vmem:[#allocation2 + $0x2b8] sm:$0xff] %v223_v23  ;;  %v227_v25 = vld [vmem:[%s807_s2 + $0x2c8] sm:$0xff] }
  0x3c   :  { %226 = vst [vmem:[#allocation2 + $0x2c0] sm:$0xff] %v225_v24  ;;  %v229_v26 = vld [vmem:[%s807_s2 + $0x2d0] sm:$0xff]  ;;  %v231_v27 = vld [vmem:[%s807_s2 + $0x2d8] sm:$0xff]  ;;  %228 = vst [vmem:[#allocation2 + $0x2c8] sm:$0xff] %v227_v25 }
  0x3d   :  { %230 = vst [vmem:[#allocation2 + $0x2d0] sm:$0xff] %v229_v26  ;;  %232 = vst [vmem:[#allocation2 + $0x2d8] sm:$0xff] %v231_v27  ;;  %v233_v28 = vld [vmem:[%s807_s2 + $0x2e0] sm:$0xff]  ;;  %v235_v29 = vld [vmem:[%s807_s2 + $0x2e8] sm:$0xff] }
  0x3e   :  { %v237_v30 = vld [vmem:[%s807_s2 + $0x2f0] sm:$0xff]  ;;  %234 = vst [vmem:[#allocation2 + $0x2e0] sm:$0xff] %v233_v28  ;;  %236 = vst [vmem:[#allocation2 + $0x2e8] sm:$0xff] %v235_v29  ;;  %v239_v31 = vld [vmem:[%s807_s2 + $0x2f8] sm:$0xff] }
  0x3f   :  { %238 = vst [vmem:[#allocation2 + $0x2f0] sm:$0xff] %v237_v30  ;;  %v241_v32 = vld [vmem:[%s807_s2 + $0x300] sm:$0xff]  ;;  %v243_v33 = vld [vmem:[%s807_s2 + $0x308] sm:$0xff]  ;;  %240 = vst [vmem:[#allocation2 + $0x2f8] sm:$0xff] %v239_v31 }
  0x40   :  { %242 = vst [vmem:[#allocation2 + $0x300] sm:$0xff] %v241_v32  ;;  %244 = vst [vmem:[#allocation2 + $0x308] sm:$0xff] %v243_v33  ;;  %v245_v34 = vld [vmem:[%s807_s2 + $0x310] sm:$0xff]  ;;  %v247_v35 = vld [vmem:[%s807_s2 + $0x318] sm:$0xff] }
  0x41   :  { %v249_v36 = vld [vmem:[%s807_s2 + $0x320] sm:$0xff]  ;;  %246 = vst [vmem:[#allocation2 + $0x310] sm:$0xff] %v245_v34  ;;  %248 = vst [vmem:[#allocation2 + $0x318] sm:$0xff] %v247_v35  ;;  %v251_v37 = vld [vmem:[%s807_s2 + $0x328] sm:$0xff] }
  0x42   :  { %250 = vst [vmem:[#allocation2 + $0x320] sm:$0xff] %v249_v36  ;;  %v253_v38 = vld [vmem:[%s807_s2 + $0x330] sm:$0xff]  ;;  %v255_v39 = vld [vmem:[%s807_s2 + $0x338] sm:$0xff]  ;;  %252 = vst [vmem:[#allocation2 + $0x328] sm:$0xff] %v251_v37 }
  0x43   :  { %254 = vst [vmem:[#allocation2 + $0x330] sm:$0xff] %v253_v38  ;;  %256 = vst [vmem:[#allocation2 + $0x338] sm:$0xff] %v255_v39  ;;  %v257_v40 = vld [vmem:[%s807_s2 + $0x340] sm:$0xff]  ;;  %v259_v41 = vld [vmem:[%s807_s2 + $0x348] sm:$0xff] }
  0x44   :  { %v261_v42 = vld [vmem:[%s807_s2 + $0x350] sm:$0xff]  ;;  %258 = vst [vmem:[#allocation2 + $0x340] sm:$0xff] %v257_v40  ;;  %260 = vst [vmem:[#allocation2 + $0x348] sm:$0xff] %v259_v41  ;;  %v263_v43 = vld [vmem:[%s807_s2 + $0x358] sm:$0xff] }
  0x45   :  { %262 = vst [vmem:[#allocation2 + $0x350] sm:$0xff] %v261_v42  ;;  %v265_v44 = vld [vmem:[%s807_s2 + $0x360] sm:$0xff]  ;;  %v267_v45 = vld [vmem:[%s807_s2 + $0x368] sm:$0xff]  ;;  %264 = vst [vmem:[#allocation2 + $0x358] sm:$0xff] %v263_v43 }
  0x46   :  { %266 = vst [vmem:[#allocation2 + $0x360] sm:$0xff] %v265_v44  ;;  %268 = vst [vmem:[#allocation2 + $0x368] sm:$0xff] %v267_v45  ;;  %v269_v46 = vld [vmem:[%s807_s2 + $0x370] sm:$0xff]  ;;  %v271_v47 = vld [vmem:[%s807_s2 + $0x378] sm:$0xff] }
  0x47   :  { %v273_v48 = vld [vmem:[%s807_s2 + $0x380] sm:$0xff]  ;;  %270 = vst [vmem:[#allocation2 + $0x370] sm:$0xff] %v269_v46  ;;  %272 = vst [vmem:[#allocation2 + $0x378] sm:$0xff] %v271_v47  ;;  %v275_v49 = vld [vmem:[%s807_s2 + $0x388] sm:$0xff] }
  0x48   :  { %274 = vst [vmem:[#allocation2 + $0x380] sm:$0xff] %v273_v48  ;;  %v277_v50 = vld [vmem:[%s807_s2 + $0x390] sm:$0xff]  ;;  %v279_v51 = vld [vmem:[%s807_s2 + $0x398] sm:$0xff]  ;;  %276 = vst [vmem:[#allocation2 + $0x388] sm:$0xff] %v275_v49 }
  0x49   :  { %278 = vst [vmem:[#allocation2 + $0x390] sm:$0xff] %v277_v50  ;;  %280 = vst [vmem:[#allocation2 + $0x398] sm:$0xff] %v279_v51  ;;  %v281_v52 = vld [vmem:[%s807_s2 + $0x3a0] sm:$0xff]  ;;  %v283_v53 = vld [vmem:[%s807_s2 + $0x3a8] sm:$0xff] }
  0x4a   :  { %v285_v54 = vld [vmem:[%s807_s2 + $0x3b0] sm:$0xff]  ;;  %282 = vst [vmem:[#allocation2 + $0x3a0] sm:$0xff] %v281_v52  ;;  %284 = vst [vmem:[#allocation2 + $0x3a8] sm:$0xff] %v283_v53  ;;  %v287_v55 = vld [vmem:[%s807_s2 + $0x3b8] sm:$0xff] }
  0x4b   :  { %286 = vst [vmem:[#allocation2 + $0x3b0] sm:$0xff] %v285_v54  ;;  %v289_v56 = vld [vmem:[%s807_s2 + $0x3c0] sm:$0xff]  ;;  %v291_v57 = vld [vmem:[%s807_s2 + $0x3c8] sm:$0xff]  ;;  %288 = vst [vmem:[#allocation2 + $0x3b8] sm:$0xff] %v287_v55 }
  0x4c   :  { %290 = vst [vmem:[#allocation2 + $0x3c0] sm:$0xff] %v289_v56  ;;  %292 = vst [vmem:[#allocation2 + $0x3c8] sm:$0xff] %v291_v57  ;;  %v293_v58 = vld [vmem:[%s807_s2 + $0x3d0] sm:$0xff]  ;;  %v295_v59 = vld [vmem:[%s807_s2 + $0x3d8] sm:$0xff] }
  0x4d   :  { %v297_v60 = vld [vmem:[%s807_s2 + $0x3e0] sm:$0xff]  ;;  %294 = vst [vmem:[#allocation2 + $0x3d0] sm:$0xff] %v293_v58  ;;  %296 = vst [vmem:[#allocation2 + $0x3d8] sm:$0xff] %v295_v59 }
  0x4e   :  { %298 = vst [vmem:[#allocation2 + $0x3e0] sm:$0xff] %v297_v60 }
  0x4f   :  { %306 = vsyncadd [#allocation3], 16000 }
  0x50   :  { %389 = dma.done.wait [#allocation3], 16000 }
  0x51   :  { %390 = vsyncadd [#allocation3], 4294951296  ;;  %s310_s6 = sld [smem:[#allocation5]]  ;;  %s349_s7 = sld [smem:[#allocation5 + $0x1]]  ;;  %vm313_vm0 = vcmask 253952  }
  0x52   :  { %s394_s8 = smov [#allocation6]  }
  0x53   :  { %s325_s9 = sshll.u32 %s394_s8, 4  ;;  %s326_s9 = int_to_ptr.vmem [resolvable:$true] %s325_s9 }
  0x54   :  { %s365_s12 = scalar_lea.vmem %s326_s9, 32  ;;  %p370_p6 = scmp.lt.s32.totalorder %s326_s9, %s326_s9 }
  0x55   :  { %p366_p5 = scmp.ne.s32.totalorder %s326_s9, %s365_s12  ;;  %p371_p7 = scmp.lt.s32.totalorder %s365_s12, %s365_s12 }
  0x57   :  { %s311_s10 = scalar_lea.vmem [#allocation2], %s310_s6  ;;  %s316_s11 = scalar_lea.vmem [#allocation2], %s349_s7 }
  0x58   :  { %v312_v61 = vld [vmem:[%s311_s10] sm:$0x1]  ;;  %p372_p8 = por %p371_p7, %p370_p6 }
  0x59   :  { %v317_v62 = vld [vmem:[%s316_s11] sm:$0x1]  ;;  %314 = vst.msk [vmem:[#allocation6] sm:$0x1] %vm313_vm0, %v312_v61 }
  0x5a   :  { %318 = vst.msk [vmem:[#allocation6 + $0x1] sm:$0x1] %vm313_vm0, %v317_v62  ;;  %p373_p9 = pnand %p372_p8, %p366_p5 }
  0x5c   :  { %376 = shalt.err (!%p373_p9)
}
  0x5d   :  { %s377_s14 = scalar_lea.hbm %s808_s3, 32 }
  0x5e   :  { %p378_p10 = scmp.ne.s32.totalorder %s808_s3, %s377_s14  ;;  %p381_p11 = scmp.lt.u32.totalorder %s377_s14, %s808_s3 }
  0x60   :  { %p383_p12 = pnand %p381_p11, %p378_p10 }
  0x62   :  { %386 = shalt.err (!%p383_p12)
}
  0x63   :  { %328 = dma.vmem_to_hbm [thread:$0]  %s326_s9, 32, %s808_s3, [#allocation7]  }
  0x64   :  { %391 = dma.done.wait [#allocation7], 32  }
  0x65   :  { %392 = vsyncadd [#allocation7], 4294967264 }
  0x66   :  { %332 = vsyncpa [#allocation7], 1 }
  0x67   :  { %333 = vsyncmov [#allocation3] }
  0x6a   :  { %s334_s19 = vpop.sfrf %333 }
  0x6b   :  { %p350_p13 = scmp.ne.s32.totalorder %s334_s19, 0 }
  0x6d   :  { %338 = shalt.err (%p350_p13)  }

</bundles_post_ra>
